<compile_context>
chip_gen: v7x
topology: tpu7x:2x2x1
jax: 0.10.0
libtpu: 0.0.40
codegen_flags: <defaults>
</compile_context>

<pallas_src>
import jax
import jax.numpy as jnp
from jax.experimental import pallas as pl
from jax.experimental.pallas import tpu as pltpu


def _round_up(x, m):
    return (x + m - 1) // m * m


def _make_rnn_seq_kernel(H, O):
    """Kernel factory; H, O are closed over as Python constants."""

    def kernel(x_ref, h0_ref, wx_ref, wh_ref, b_ref, out_ref, h_scratch):
        t = pl.program_id(0)

        @pl.when(t == 0)
        def _():
            h_scratch[...] = h0_ref[...].astype(jnp.float32)

        x_t = x_ref[0]                                   # (B, I)
        h = h_scratch[...]                               # (B, H_pad) f32 carry

        # Fused i2h + i2o matmul (one MXU result tile), f32 accumulation.
        fused = (
            jnp.dot(x_t.astype(wx_ref.dtype), wx_ref[...],
                    preferred_element_type=jnp.float32)
            + jnp.dot(h.astype(wh_ref.dtype), wh_ref[...],
                      preferred_element_type=jnp.float32)
            + b_ref[...]
        )                                                # (B, P) f32

        B, P = fused.shape
        lane = jax.lax.broadcasted_iota(jnp.int32, (B, P), 1)
        is_logit = (lane >= H) & (lane < H + O)

        # Numerically stable log-softmax over the O logit lanes only (all f32).
        masked = jnp.where(is_logit, fused, -jnp.inf)
        m = jnp.max(masked, axis=1, keepdims=True)
        z = jnp.where(is_logit, fused - m, -jnp.inf)     # exp(-inf) = 0 on pad lanes
        lse = jnp.log(jnp.sum(jnp.exp(z), axis=1, keepdims=True))
        packed = jnp.where(is_logit, fused - m - lse, fused)

        # Lane-dense packed store: hidden in [0, H), log-probs in [H, H+O).
        out_ref[0] = packed.astype(out_ref.dtype)

        # Carry the new hidden state.  Lanes >= H multiply zero rows of wh, so
        # storing the whole packed slab (which contains log-probs there) is safe.
        h_scratch[...] = packed[:, : h_scratch.shape[1]]

    return kernel


def rnn_sequence_forward(x_seq, hidden, w_i2h, b_i2h, w_i2o, b_i2o,
                         compute_dtype=jnp.float32):
    """Apply the RNN cell over a whole sequence inside one pallas_call.

    x_seq  : (T, B, I)
    hidden : (B, H) initial hidden state
    w_i2h  : (H, I+H), b_i2h: (H,)     torch nn.Linear layout
    w_i2o  : (O, I+H), b_i2o: (O,)
    Returns (log_probs (T, B, O), final_hidden (B, H)).
    """
    T, B, I = x_seq.shape
    H = w_i2h.shape[0]
    O = w_i2o.shape[0]
    C = I + H
    assert w_i2h.shape == (H, C) and w_i2o.shape == (O, C)

    LANES = 128
    P = _round_up(H + O, LANES)          # fused / packed output width (lane-dense)
    H_pad = _round_up(H, LANES)          # hidden-carry width

    f32 = jnp.float32
    # Fused, pre-transposed, lane-padded weights — prepared once per sequence call,
    # never per step.  Columns [0, H) -> i2h, [H, H+O) -> i2o, rest zero.
    w_cat = jnp.concatenate([w_i2h.T, w_i2o.T], axis=1).astype(f32)     # (C, H+O)
    w_cat = jnp.pad(w_cat, ((0, 0), (0, P - (H + O))))                  # (C, P)
    wx = w_cat[:I].astype(compute_dtype)                                # (I, P)
    wh = jnp.zeros((H_pad, P), f32).at[:H].set(w_cat[I:]).astype(compute_dtype)
    b_cat = jnp.pad(jnp.concatenate([b_i2h, b_i2o]).astype(f32),
                    (0, P - (H + O))).reshape(1, P)                     # (1, P)
    h0 = jnp.pad(hidden.astype(f32), ((0, 0), (0, H_pad - H)))          # (B, H_pad)
    x_in = x_seq.astype(compute_dtype)

    kernel = _make_rnn_seq_kernel(H, O)

    grid_spec = pltpu.PrefetchScalarGridSpec(
        num_scalar_prefetch=0,
        grid=(T,),
        in_specs=[
            pl.BlockSpec((1, B, I), lambda t: (t, 0, 0)),       # x_t streamed per step
            pl.BlockSpec((B, H_pad), lambda t: (0, 0)),         # h0: VMEM-resident
            pl.BlockSpec((I, P), lambda t: (0, 0)),             # weights: VMEM-resident
            pl.BlockSpec((H_pad, P), lambda t: (0, 0)),
            pl.BlockSpec((1, P), lambda t: (0, 0)),             # fused bias
        ],
        out_specs=pl.BlockSpec((1, B, P), lambda t: (t, 0, 0)),  # lane-dense slab
        scratch_shapes=[pltpu.VMEM((B, H_pad), jnp.float32)],    # hidden carry
    )

    packed = pl.pallas_call(
        kernel,
        out_shape=jax.ShapeDtypeStruct((T, B, P), jnp.float32),
        grid_spec=grid_spec,
        compiler_params=pltpu.CompilerParams(
            dimension_semantics=("arbitrary",)),   # hidden carries across time steps
    )(x_in, h0, wx, wh, b_cat)

    log_probs = packed[:, :, H:H + O].astype(x_seq.dtype)
    final_hidden = packed[-1, :, :H].astype(hidden.dtype)
    return log_probs, final_hidden


def rnn_forward(x, hidden, w_i2h, b_i2h, w_i2o, b_i2o, compute_dtype=jnp.float32):
    """Single step, matching RNN.forward(input, hidden) -> (output, hidden)."""
    out_seq, new_hidden = rnn_sequence_forward(
        x[None], hidden, w_i2h, b_i2h, w_i2o, b_i2o, compute_dtype=compute_dtype)
    return out_seq[0], new_hidden


# ------------------------- pure-JAX reference -------------------------

def _ref_step(x, hidden, w_i2h, b_i2h, w_i2o, b_i2o):
    combined = jnp.concatenate([x, hidden], axis=1)
    new_hidden = combined @ w_i2h.T + b_i2h
    logits = combined @ w_i2o.T + b_i2o
    log_probs = logits - jax.scipy.special.logsumexp(logits, axis=1, keepdims=True)
    return log_probs, new_hidden


def _ref_sequence(x_seq, hidden, w_i2h, b_i2h, w_i2o, b_i2o):
    outs = []
    for t in range(x_seq.shape[0]):
        out, hidden = _ref_step(x_seq[t], hidden, w_i2h, b_i2h, w_i2o, b_i2o)
        outs.append(out)
    return jnp.stack(outs), hidden


if __name__ == "__main__":
    # Small shapes: seq=8, batch=2, input_size=16, hidden_size=32, output_size=8
    T, B, I, H, O = 8, 2, 16, 32, 8
    C = I + H

    key = jax.random.PRNGKey(0)
    k1, k2, k3, k4, k5 = jax.random.split(key, 5)

    x_seq = jax.random.normal(k1, (T, B, I), dtype=jnp.float32)
    hidden0 = jnp.zeros((B, H), dtype=jnp.float32)       # initHidden(), broadcast over batch

    bound = 1.0 / (C ** 0.5)                             # nn.Linear default init range
    w_i2h = jax.random.uniform(k2, (H, C), jnp.float32, -bound, bound)
    b_i2h = jax.random.uniform(k3, (H,), jnp.float32, -bound, bound)
    w_i2o = jax.random.uniform(k4, (O, C), jnp.float32, -bound, bound)
    b_i2o = jax.random.uniform(k5, (O,), jnp.float32, -bound, bound)

    # --- Single step (exact module forward semantics) ---
    out1, hid1 = rnn_forward(x_seq[0], hidden0, w_i2h, b_i2h, w_i2o, b_i2o)
    jax.block_until_ready((out1, hid1))
    ref_out1, ref_hid1 = _ref_step(x_seq[0], hidden0, w_i2h, b_i2h, w_i2o, b_i2o)
    assert out1.shape == (B, O) and hid1.shape == (B, H)
    assert jnp.allclose(out1, ref_out1, atol=1e-4, rtol=1e-4)
    assert jnp.allclose(hid1, ref_hid1, atol=1e-4, rtol=1e-4)

    # --- Full sequence in one pallas_call (the fast path) ---
    out_seq, hid_T = rnn_sequence_forward(x_seq, hidden0, w_i2h, b_i2h, w_i2o, b_i2o)
    jax.block_until_ready((out_seq, hid_T))
    ref_seq, ref_hid_T = _ref_sequence(x_seq, hidden0, w_i2h, b_i2h, w_i2o, b_i2o)
    assert out_seq.shape == (T, B, O) and hid_T.shape == (B, H)
    assert jnp.allclose(out_seq, ref_seq, atol=1e-4, rtol=1e-4)
    assert jnp.allclose(hid_T, ref_hid_T, atol=1e-4, rtol=1e-4)

    # --- bf16 matmul operands (v6e/v7x MXU fast path), f32 accumulation/softmax ---
    out_bf, hid_bf = rnn_sequence_forward(x_seq, hidden0, w_i2h, b_i2h, w_i2o, b_i2o,
                                          compute_dtype=jnp.bfloat16)
    jax.block_until_ready((out_bf, hid_bf))
    assert jnp.allclose(out_bf, ref_seq, atol=5e-2, rtol=5e-2)
    assert jnp.allclose(hid_bf, ref_hid_T, atol=5e-2, rtol=5e-2)

    print("KERNEL_OK")
</pallas_src>

<mosaic_0001>
module attributes {stable_mosaic.version = 11 : i64} {
  func.func @kernel(%arg0: i32, %arg1: memref<1x2x16xf32, #tpu.memory_space<vmem>>, %arg2: memref<2x128xf32, #tpu.memory_space<vmem>>, %arg3: memref<16x128xf32, #tpu.memory_space<vmem>>, %arg4: memref<128x128xf32, #tpu.memory_space<vmem>>, %arg5: memref<1x128xf32, #tpu.memory_space<vmem>>, %arg6: memref<1x2x128xf32, #tpu.memory_space<vmem>>, %arg7: memref<2x128xf32, #tpu.memory_space<vmem>>) attributes {dimension_semantics = [#tpu.dimension_semantics<arbitrary>], iteration_bounds = array<i64: 1>, scalar_prefetch = 0 : i64, scratch_operands = 1 : i64, tpu.core_type = #tpu.core_type<tc>, window_params = [{transform_indices = @transform_0, window_bounds = array<i64: 1, 2, 16>}, {pipeline_mode = #tpu.pipeline_mode<synchronous>, transform_indices = @transform_1, window_bounds = array<i64: 2, 128>}, {pipeline_mode = #tpu.pipeline_mode<synchronous>, transform_indices = @transform_2, window_bounds = array<i64: 16, 128>}, {pipeline_mode = #tpu.pipeline_mode<synchronous>, transform_indices = @transform_3, window_bounds = array<i64: 128, 128>}, {pipeline_mode = #tpu.pipeline_mode<synchronous>, transform_indices = @transform_4, window_bounds = array<i64: 1, 128>}, {transform_indices = @transform_5, window_bounds = array<i64: 1, 2, 128>}]} {
    %c0_i32 = arith.constant 0 : i32
    %0 = arith.cmpi eq, %arg0, %c0_i32 : i32
    %1 = arith.extui %0 : i1 to i32
    %c0_i32_0 = arith.constant 0 : i32
    %2 = arith.cmpi ne, %1, %c0_i32_0 : i32
    scf.if %2 {
      %c0_21 = arith.constant 0 : index
      %c0_22 = arith.constant 0 : index
      %41 = vector.load %arg2[%c0_21, %c0_22] : memref<2x128xf32, #tpu.memory_space<vmem>>, vector<2x128xf32>
      %c0_23 = arith.constant 0 : index
      %c0_24 = arith.constant 0 : index
      %42 = vector.load %arg7[%c0_23, %c0_24] : memref<2x128xf32, #tpu.memory_space<vmem>>, vector<2x128xf32>
      tpu.vector_store %arg7[%c0_23, %c0_24], %41 {strides = array<i32>} : memref<2x128xf32, #tpu.memory_space<vmem>>, vector<2x128xf32>,
    } else {
    }
    %c0 = arith.constant 0 : index
    %c0_1 = arith.constant 0 : index
    %c0_2 = arith.constant 0 : index
    %3 = vector.load %arg1[%c0, %c0_1, %c0_2] : memref<1x2x16xf32, #tpu.memory_space<vmem>>, vector<1x2x16xf32>
    %4 = vector.shape_cast %3 : vector<1x2x16xf32> to vector<2x16xf32>
    %c0_3 = arith.constant 0 : index
    %c0_4 = arith.constant 0 : index
    %5 = vector.load %arg7[%c0_3, %c0_4] : memref<2x128xf32, #tpu.memory_space<vmem>>, vector<2x128xf32>
    %c0_5 = arith.constant 0 : index
    %c0_6 = arith.constant 0 : index
    %6 = vector.load %arg3[%c0_5, %c0_6] : memref<16x128xf32, #tpu.memory_space<vmem>>, vector<16x128xf32>
    %cst = arith.constant dense<0.000000e+00> : vector<2x128xf32>
    %7 = tpu.matmul %4, %6, %cst {dimension_numbers = #tpu.dot_dimension_numbers<[1], [0], [0], [1], [0, 0, 1, 1], [], []>} : vector<2x16xf32>, vector<16x128xf32>, vector<2x128xf32> -> vector<2x128xf32>
    %c0_7 = arith.constant 0 : index
    %c0_8 = arith.constant 0 : index
    %8 = vector.load %arg4[%c0_7, %c0_8] : memref<128x128xf32, #tpu.memory_space<vmem>>, vector<128x128xf32>
    %cst_9 = arith.constant dense<0.000000e+00> : vector<2x128xf32>
    %9 = tpu.matmul %5, %8, %cst_9 {dimension_numbers = #tpu.dot_dimension_numbers<[1], [0], [0], [1], [0, 0, 1, 1], [], []>} : vector<2x128xf32>, vector<128x128xf32>, vector<2x128xf32> -> vector<2x128xf32>
    %10 = arith.addf %7, %9 : vector<2x128xf32>
    %c0_10 = arith.constant 0 : index
    %c0_11 = arith.constant 0 : index
    %11 = vector.load %arg5[%c0_10, %c0_11] : memref<1x128xf32, #tpu.memory_space<vmem>>, vector<1x128xf32>
    %12 = vector.broadcast %11 : vector<1x128xf32> to vector<2x128xf32>
    %13 = arith.addf %10, %12 : vector<2x128xf32>
    %14 = tpu.iota {dimensions = array<i32: 1>} : vector<2x128xi32>
    %c32_i32 = arith.constant 32 : i32
    %15 = vector.broadcast %c32_i32 : i32 to vector<2x128xi32>
    %16 = arith.cmpi sge, %14, %15 : vector<2x128xi32>
    %c40_i32 = arith.constant 40 : i32
    %17 = vector.broadcast %c40_i32 : i32 to vector<2x128xi32>
    %18 = arith.cmpi slt, %14, %17 : vector<2x128xi32>
    %19 = arith.andi %16, %18 : vector<2x128xi1>
    %cst_12 = arith.constant 0xFF800000 : f32
    %20 = vector.broadcast %cst_12 : f32 to vector<2x128xf32>
    %21 = arith.select %19, %13, %20 : vector<2x128xi1>, vector<2x128xf32>
    %cst_13 = arith.constant dense<0xFF800000> : vector<2xf32>
    %22 = vector.multi_reduction <maximumf>, %21, %cst_13 [1] : vector<2x128xf32> to vector<2xf32>
    %23 = vector.shape_cast %22 : vector<2xf32> to vector<2x1xf32>
    %24 = vector.broadcast %23 : vector<2x1xf32> to vector<2x128xf32>
    %25 = arith.subf %13, %24 : vector<2x128xf32>
    %cst_14 = arith.constant 0xFF800000 : f32
    %26 = vector.broadcast %cst_14 : f32 to vector<2x128xf32>
    %27 = arith.select %19, %25, %26 : vector<2x128xi1>, vector<2x128xf32>
    %28 = math.exp %27 : vector<2x128xf32>
    %cst_15 = arith.constant dense<0.000000e+00> : vector<2xf32>
    %29 = vector.multi_reduction <add>, %28, %cst_15 [1] : vector<2x128xf32> to vector<2xf32>
    %30 = vector.shape_cast %29 : vector<2xf32> to vector<2x1xf32>
    %31 = math.log %30 : vector<2x1xf32>
    %32 = vector.broadcast %23 : vector<2x1xf32> to vector<2x128xf32>
    %33 = arith.subf %13, %32 : vector<2x128xf32>
    %34 = vector.broadcast %31 : vector<2x1xf32> to vector<2x128xf32>
    %35 = arith.subf %33, %34 : vector<2x128xf32>
    %36 = arith.select %19, %35, %13 : vector<2x128xi1>, vector<2x128xf32>
    %c0_16 = arith.constant 0 : index
    %c0_17 = arith.constant 0 : index
    %c0_18 = arith.constant 0 : index
    %37 = vector.load %arg6[%c0_16, %c0_17, %c0_18] : memref<1x2x128xf32, #tpu.memory_space<vmem>>, vector<1x2x128xf32>
    %38 = vector.shape_cast %37 : vector<1x2x128xf32> to vector<2x128xf32>
    %39 = vector.shape_cast %36 : vector<2x128xf32> to vector<1x2x128xf32>
    tpu.vector_store %arg6[%c0_16, %c0_17, %c0_18], %39 {strides = array<i32>} : memref<1x2x128xf32, #tpu.memory_space<vmem>>, vector<1x2x128xf32>,
    %c0_19 = arith.constant 0 : index
    %c0_20 = arith.constant 0 : index
    %40 = vector.load %arg7[%c0_19, %c0_20] : memref<2x128xf32, #tpu.memory_space<vmem>>, vector<2x128xf32>
    tpu.vector_store %arg7[%c0_19, %c0_20], %36 {strides = array<i32>} : memref<2x128xf32, #tpu.memory_space<vmem>>, vector<2x128xf32>,
    return
  }
  func.func @transform_0(%arg0: i32) -> (i32, i32, i32) {
    %c0_i32 = arith.constant 0 : i32
    %c0_i32_0 = arith.constant 0 : i32
    %c0_i32_1 = arith.constant 0 : i32
    return %arg0, %c0_i32, %c0_i32_0 : i32, i32, i32
  }
  func.func @transform_1(%arg0: i32) -> (i32, i32) {
    %c0_i32 = arith.constant 0 : i32
    %c0_i32_0 = arith.constant 0 : i32
    %c0_i32_1 = arith.constant 0 : i32
    return %c0_i32, %c0_i32_0 : i32, i32
  }
  func.func @transform_2(%arg0: i32) -> (i32, i32) {
    %c0_i32 = arith.constant 0 : i32
    %c0_i32_0 = arith.constant 0 : i32
    %c0_i32_1 = arith.constant 0 : i32
    return %c0_i32, %c0_i32_0 : i32, i32
  }
  func.func @transform_3(%arg0: i32) -> (i32, i32) {
    %c0_i32 = arith.constant 0 : i32
    %c0_i32_0 = arith.constant 0 : i32
    %c0_i32_1 = arith.constant 0 : i32
    return %c0_i32, %c0_i32_0 : i32, i32
  }
  func.func @transform_4(%arg0: i32) -> (i32, i32) {
    %c0_i32 = arith.constant 0 : i32
    %c0_i32_0 = arith.constant 0 : i32
    %c0_i32_1 = arith.constant 0 : i32
    return %c0_i32, %c0_i32_0 : i32, i32
  }
  func.func @transform_5(%arg0: i32) -> (i32, i32, i32) {
    %c0_i32 = arith.constant 0 : i32
    %c0_i32_0 = arith.constant 0 : i32
    %c0_i32_1 = arith.constant 0 : i32
    return %arg0, %c0_i32, %c0_i32_0 : i32, i32, i32
  }
}

</mosaic_0001>

<bundles_post_ra>
// kernel: tpu_custom_call.1
= control target key start
LH: loop header
LB: loop body
LE: loop exit
PB: predicated region body
PF: predicated region fallthrough
CT: control target
= control target key end

     0   :  { %10 = vsyncpa [#allocation4], 0  ;;  %s584_s0 = inlined_call_operand.hbm [shape: f32[1,2,16], index: 0, kind: input, shape index: {}]   ;;  %s585_s1 = inlined_call_operand.vmem [shape: f32[2,128], index: 1, kind: input, shape index: {}]   ;;  %s586_s2 = inlined_call_operand.hbm [shape: f32[16,128], index: 2, kind: input, shape index: {}]   ;;  %s587_s3 = inlined_call_operand.hbm [shape: f32[128,128], index: 3, kind: input, shape index: {}]   ;;  %s588_s4 = inlined_call_operand.vmem [shape: f32[1,128], index: 4, kind: input, shape index: {}]   ;;  %s589_s5 = inlined_call_operand.hbm [shape: f32[1,2,128], index: 5, kind: output, shape index: {}]  }
   0x1   :  { %11 = vsyncpa [#allocation7], 0 }
   0x2   :  { %12 = vsyncpa [#allocation5], 0  ;;  %s475_s18 = smov [#allocation6]   ;;  %s381_s22 = scalar_lea.hbm %s586_s2, 256 }
   0x3   :  { %s30_s19 = sshll.u32 %s475_s18, 4  ;;  %p382_p0 = scmp.ne.s32.totalorder %s586_s2, %s381_s22  ;;  %s31_s19 = int_to_ptr.vmem [resolvable:$true] %s30_s19 }
   0x4   :  { %p385_p1 = scmp.lt.u32.totalorder %s381_s22, %s586_s2 }
   0x6   :  { %p387_p2 = pnand %p385_p1, %p382_p0 }
   0x8   :  { %390 = shalt.err (!%p387_p2)
}
   0x9   :  { %s391_s27 = scalar_lea.vmem %s31_s19, 256  ;;  %p396_p4 = scmp.lt.s32.totalorder %s31_s19, %s31_s19 }
   0xa   :  { %p392_p3 = scmp.ne.s32.totalorder %s31_s19, %s391_s27  ;;  %p397_p5 = scmp.lt.s32.totalorder %s391_s27, %s391_s27 }
   0xc   :  { %p398_p6 = por %p397_p5, %p396_p4 }
   0xe   :  { %p399_p7 = pnand %p398_p6, %p392_p3 }
  0x10   :  { %402 = shalt.err (!%p399_p7)
}
  0x11   :  { %s476_s28 = smov 128   ;;  %s477_s29 = smov 8  }
  0x12   :  { %36 = dma.hbm_to_vmem [thread:$0]  %s586_s2, 256, %s31_s19, [#allocation7], %s476_s28, %s476_s28, %s477_s29  }
  0x13   :  { %s478_s7 = smov [#allocation3]   ;;  %s479_s9 = smov [#allocation8]  }
  0x14   :  { %s19_s8 = sshll.u32 %s478_s7, 4  ;;  %s42_s10 = sshll.u32 %s479_s9, 4  ;;  %s20_s8 = int_to_ptr.vmem [resolvable:$true] %s19_s8  ;;  %s43_s10 = int_to_ptr.vmem [resolvable:$true] %s42_s10 }
  0x15   :  { %s403_s13 = scalar_lea.hbm %s584_s0, 32 }
  0x16   :  { %p404_p8 = scmp.ne.s32.totalorder %s584_s0, %s403_s13  ;;  %p407_p9 = scmp.lt.u32.totalorder %s403_s13, %s584_s0 }
  0x18   :  { %p409_p10 = pnand %p407_p9, %p404_p8 }
  0x1a   :  { %412 = shalt.err (!%p409_p10)
}
  0x1b   :  { %s413_s2 = scalar_lea.vmem %s20_s8, 32  ;;  %p418_p12 = scmp.lt.s32.totalorder %s20_s8, %s20_s8 }
  0x1c   :  { %p414_p11 = scmp.ne.s32.totalorder %s20_s8, %s413_s2  ;;  %p419_p13 = scmp.lt.s32.totalorder %s413_s2, %s413_s2 }
  0x1e   :  { %p420_p0 = por %p419_p13, %p418_p12 }
  0x20   :  { %p421_p1 = pnand %p420_p0, %p414_p11 }
  0x22   :  { %424 = shalt.err (!%p421_p1)
}
  0x23   :  { %22 = dma.hbm_to_vmem [thread:$0]  %s584_s0, 32, %s20_s8, [#allocation4]  }
  0x24   :  { %s425_s22 = scalar_lea.hbm %s587_s3, 2048 }
  0x25   :  { %p426_p2 = scmp.ne.s32.totalorder %s587_s3, %s425_s22  ;;  %p429_p3 = scmp.lt.u32.totalorder %s425_s22, %s587_s3 }
  0x27   :  { %p431_p4 = pnand %p429_p3, %p426_p2 }
  0x29   :  { %434 = shalt.err (!%p431_p4)
}
  0x2a   :  { %s435_s27 = scalar_lea.vmem %s43_s10, 2048  ;;  %p440_p6 = scmp.lt.s32.totalorder %s43_s10, %s43_s10 }
  0x2b   :  { %p436_p5 = scmp.ne.s32.totalorder %s43_s10, %s435_s27  ;;  %p441_p7 = scmp.lt.s32.totalorder %s435_s27, %s435_s27 }
  0x2d   :  { %p442_p8 = por %p441_p7, %p440_p6 }
  0x2f   :  { %p443_p9 = pnand %p442_p8, %p436_p5 }
  0x31   :  { %446 = shalt.err (!%p443_p9)
}
  0x32   :  { %48 = dma.hbm_to_vmem [thread:$0]  %s587_s3, 2048, %s43_s10, [#allocation7], %s476_s28, %s476_s28, %s477_s29  }
  0x33   :  { %469 = dma.done.wait [#allocation4], 32  }
  0x34   :  { %470 = vsyncadd [#allocation4], 4294967264 }
  0x35   :  { %471 = dma.done.wait [#allocation7], 2304  }
  0x36   :  { %472 = vsyncadd [#allocation7], 4294964992  ;;  %v480_v0 = vmov 0.0|0.0   ;;  %vm481_vm0 = vmmov 0   ;;  %v482_v1 = vmov 0.0   ;;  %v70_v2 = vld [vmem:[#allocation8] sm:$0xff]  ;;  %v238_v34 = vlaneseq }
  0x37   :  { %341 = vmatprep.subr.bf16.mxu0 %v480_v0  ;;  %365 = vmatprep.subr.bf16.mxu1 %v480_v0  ;;  %v71_v3 = vld [vmem:[#allocation8 + $0x8] sm:$0xff]  ;;  %v72_v4 = vld [vmem:[#allocation8 + $0x10] sm:$0xff]  ;;  %v73_v6 = vld [vmem:[#allocation8 + $0x18] sm:$0xff]  ;;  %vm156_vm1 = vcmask 130048   ;;  %vm244_vm5 = vcmask 1041408  }
  0x38   :  { %338 = vmatprep.mubr.msk.f32.mxu1 %vm481_vm0, %v482_v1  ;;  %331 = vmatprep.mubr.msk.f32.mxu0 %vm481_vm0, %v482_v1  ;;  %v342_v5 = vpack.c.bf16 %v71_v3, %v70_v2  ;;  %v345_v7 = vpack.c.bf16 %v73_v6, %v72_v4  ;;  %v74_v8 = vld [vmem:[#allocation8 + $0x20] sm:$0xff]  ;;  %v75_v9 = vld [vmem:[#allocation8 + $0x28] sm:$0xff]  ;;  %v68_v10 = vld [vmem:[#allocation6] sm:$0xff]  ;;  %v239_v35 = vand.u32 127, %v238_v34 }
  0x39   :  { %v69_v11 = vld [vmem:[#allocation6 + $0x8] sm:$0xff]  ;;  %v64_v13 = vld [vmem:[%s585_s1] sm:$0x3]  ;;  %v348_v14 = vpack.c.bf16 %v75_v9, %v74_v8  ;;  %v76_v15 = vld [vmem:[#allocation8 + $0x30] sm:$0xff] }
  0x3a   :  { %343 = vmatpush3.bf16.msra.mxu0 %v342_v5  ;;  %v366_v12 = vpack.c.bf16 %v69_v11, %v68_v10  ;;  %65 = vst [vmem:[#allocation2] sm:$0x3] %v64_v13  ;;  %v77_v16 = vld [vmem:[#allocation8 + $0x38] sm:$0xff]  ;;  %v66_v17 = vld [vmem:[#allocation3] sm:$0x3]  ;;  %v78_v19 = vld [vmem:[#allocation8 + $0x40] sm:$0xff] }
  0x3b   :  { %344 = vmatprep.subr.bf16.mxu0 %v480_v0  ;;  %v351_v18 = vpack.c.bf16 %v77_v16, %v76_v15  ;;  %v79_v20 = vld [vmem:[#allocation8 + $0x48] sm:$0xff]  ;;  %v80_v22 = vld [vmem:[#allocation8 + $0x50] sm:$0xff]  ;;  %v81_v23 = vld [vmem:[#allocation8 + $0x58] sm:$0xff]  ;;  %vm240_vm2 = vcmp.ge.s32.totalorder %v239_v35, 32  ;;  %vm241_vm3 = vcmp.lt.s32.totalorder %v239_v35, 40 }
  0x3c   :  { %367 = vmatpush3.bf16.msra.mxu1 %v366_v12  ;;  %v354_v21 = vpack.c.bf16 %v79_v20, %v78_v19  ;;  %v357_v24 = vpack.c.bf16 %v81_v23, %v80_v22  ;;  %v82_v25 = vld [vmem:[#allocation8 + $0x60] sm:$0xff]  ;;  %v83_v26 = vld [vmem:[#allocation8 + $0x68] sm:$0xff]  ;;  %v84_v28 = vld [vmem:[#allocation8 + $0x70] sm:$0xff] }
  0x3d   :  { %v360_v27 = vpack.c.bf16 %v83_v26, %v82_v25  ;;  %v85_v29 = vld [vmem:[#allocation8 + $0x78] sm:$0xff]  ;;  %v278_v37 = vld [vmem:[%s588_s4] ss:$0 sm:$0xff]  ;;  %vm562_vm4 = vmand %vm240_vm2, %vm241_vm3  ;;  %s483_s4 = smov [#allocation9]  }
  0x3e   :  { %346 = vmatpush3.bf16.msra.mxu0 %v345_v7  ;;  %v363_v30 = vpack.c.bf16 %v85_v29, %v84_v28  ;;  %s267_s6 = sshll.u32 %s483_s4, 4  ;;  %s268_s6 = int_to_ptr.vmem [resolvable:$true] %s267_s6 }
  0x3f   :  { %347 = vmatprep.subr.bf16.mxu0 %v480_v0  ;;  %339 = vmatmul.mubr.msk.f32.vlgmr.msra.gmra.mrb[0].mxu1 %vm156_vm1, %v66_v17  ;;  %s447_s7 = scalar_lea.vmem %s268_s6, 32  ;;  %p452_p11 = scmp.lt.s32.totalorder %s268_s6, %s268_s6 }
  0x40   :  { %p448_p10 = scmp.ne.s32.totalorder %s268_s6, %s447_s7  ;;  %p453_p12 = scmp.lt.s32.totalorder %s447_s7, %s447_s7 }
  0x41   :  { %v67_v31 = vld [vmem:[#allocation2] sm:$0x3] }
  0x42   :  { %349 = vmatpush3.bf16.msra.mxu0 %v348_v14  ;;  %p454_p13 = por %p453_p12, %p452_p11 }
  0x43   :  { %350 = vmatprep.subr.bf16.mxu0 %v480_v0 }
  0x44   :  { %p455_p0 = pnand %p454_p13, %p448_p10 }
  0x46   :  { %352 = vmatpush3.bf16.msra.mxu0 %v351_v18 }
  0x47   :  { %353 = vmatprep.subr.bf16.mxu0 %v480_v0 }
  0x4a   :  { %355 = vmatpush3.bf16.msra.mxu0 %v354_v21 }
  0x4b   :  { %356 = vmatprep.subr.bf16.mxu0 %v480_v0 }
  0x4e   :  { %358 = vmatpush3.bf16.msra.mxu0 %v357_v24 }
  0x4f   :  { %359 = vmatprep.subr.bf16.mxu0 %v480_v0 }
  0x52   :  { %361 = vmatpush3.bf16.msra.mxu0 %v360_v27 }
  0x53   :  { %362 = vmatprep.subr.bf16.mxu0 %v480_v0 }
  0x56   :  { %364 = vmatpush3.bf16.msra.mxu0 %v363_v30 }
  0x59   :  { %332 = vmatmul.mubr.f32.vlgmr.msra.gmra.mrb[0].mxu0 %v67_v31 }
 0x112   :  { %v226_v32 = vpop.f32.mrb[0].mxu1 }
 0x113   :  { %v340_v33 = vpop.f32.mrb[1].mxu1 }
 0x12c   :  { %v152_v36 = vpop.f32.mrb[0].mxu0 }
 0x12d   :  { %v227_v38 = vadd.f32 %v226_v32, %v152_v36  ;;  %v333_v39 = vpop.f32.mrb[1].mxu0 }
 0x12f   :  { %v237_v41 = vadd.f32 %v278_v37, %v227_v38 }
 0x131   :  { %v243_v42 = vsel %vm562_vm4, %v237_v41, -inf }
 0x132   :  { %v245_v43 = vsel %vm244_vm5, %v243_v42, -inf }
 0x133   :  { %246 = vmax.xlane.f32.xlu0 %v245_v43 }
 0x1c0   :  { %v247_v44 = vpop.xlane.xlu0 %246 }
 0x1c1   :  { %v248_v45 = vsub.f32 %v237_v41, %v247_v44 }
 0x1c3   :  { %v249_v46 = vsel %vm562_vm4, %v248_v45, -inf }
 0x1c4   :  { %v250_v47 = vmul.f32 1.442695, %v249_v46 }
 0x1c6   :  { %377 = vpow2.f32 %v250_v47 }
 0x1d0   :  { %v378_v48 = vpop.eup %377 }
 0x1d1   :  { %v252_v49 = vsel %vm244_vm5, %v378_v48, 0.0 }
 0x1d2   :  { %253 = vadd.xlane.f32.xlu0 %v252_v49 }
 0x25f   :  { %v254_v50 = vpop.xlane.xlu0 %253 }
 0x260   :  { %379 = vlog2.f32 %v254_v50 }
 0x26a   :  { %v380_v51 = vpop.eup %379 }
 0x26b   :  { %v256_v52 = vmul.f32 0.6931472, %v380_v51 }
 0x26d   :  { %v257_v53 = vsub.f32 %v248_v45, %v256_v52 }
 0x26f   :  { %v258_v54 = vsel %vm562_vm4, %v257_v53, %v237_v41 }
 0x270   :  { %259 = vst [vmem:[#allocation9] sm:$0x3] %v258_v54  ;;  %260 = vst [vmem:[#allocation2] sm:$0x3] %v258_v54 }
 0x271   :  { %458 = shalt.err (!%p455_p0)
}
 0x272   :  { %s459_s10 = scalar_lea.hbm %s589_s5, 32 }
 0x273   :  { %p460_p1 = scmp.ne.s32.totalorder %s589_s5, %s459_s10  ;;  %p463_p2 = scmp.lt.u32.totalorder %s459_s10, %s589_s5 }
 0x275   :  { %p465_p3 = pnand %p463_p2, %p460_p1 }
 0x277   :  { %468 = shalt.err (!%p465_p3)
}
 0x278   :  { %270 = dma.vmem_to_hbm [thread:$0]  %s268_s6, 32, %s589_s5, [#allocation5]  }
 0x279   :  { %473 = dma.done.wait [#allocation5], 32  }
 0x27a   :  { %474 = vsyncadd [#allocation5], 4294967264 }
 0x27b   :  { %274 = vsyncpa [#allocation4], 1 }
 0x27c   :  { %275 = vsyncpa [#allocation7], 1 }
 0x27d   :  { %276 = vsyncpa [#allocation5], 1 }

</bundles_post_ra>
